<compile_context>
chip_gen: v5e
topology: v5e:2x2
jax: 0.10.0
libtpu: 0.0.40
codegen_flags: <defaults>
</compile_context>

<pallas_src>
import jax
import jax.numpy as jnp
from jax.experimental import pallas as pl
from jax.experimental.pallas import tpu as pltpu

LANE = 128      # TPU lane width (last-dim alignment)
SUBLANE = 8     # TPU sublane width (second-to-last-dim alignment, f32)


def _round_up(x, m):
    return ((x + m - 1) // m) * m


# ----------------------------------------------------------------------------
# Kernel: fused 3-layer MLP on one (tm, in_size) batch tile.  Weights and
# biases use constant index_maps, so they stay VMEM-resident across steps.
# ----------------------------------------------------------------------------
def object_model_kernel(x_ref, w1_ref, b1_ref, w2_ref, b2_ref, w3_ref, b3_ref,
                        o_ref):
    wd = w1_ref.dtype  # f32 or bf16 (opt-in); accumulation is always f32.
    x = x_ref[...]
    h = jnp.dot(x.astype(wd), w1_ref[...], preferred_element_type=jnp.float32)
    h = jnp.maximum(h + b1_ref[0:1, :], 0.0)
    h = jnp.dot(h.astype(wd), w2_ref[...], preferred_element_type=jnp.float32)
    h = jnp.maximum(h + b2_ref[0:1, :], 0.0)
    out = jnp.dot(h.astype(wd), w3_ref[...], preferred_element_type=jnp.float32)
    out = out + b3_ref[0:1, :]
    o_ref[...] = out.astype(o_ref.dtype)


# ----------------------------------------------------------------------------
# Parameter prep
# ----------------------------------------------------------------------------
def init_params(key, input_size, output_size, hidden_size):
    """Deterministic synthetic parameters (uniform, like PyTorch Linear init).

    Weights are [in_features, out_features] (transpose of nn.Linear) so the
    kernel computes x @ W + b.  Biases are [1, out_features].
    """
    ks = jax.random.split(key, 6)

    def linear(kw, kb, fan_in, fan_out):
        bound = 1.0 / jnp.sqrt(fan_in)
        w = jax.random.uniform(kw, (fan_in, fan_out), jnp.float32, -bound, bound)
        b = jax.random.uniform(kb, (1, fan_out), jnp.float32, -bound, bound)
        return w, b

    w1, b1 = linear(ks[0], ks[1], input_size, hidden_size)
    w2, b2 = linear(ks[2], ks[3], hidden_size, hidden_size)
    w3, b3 = linear(ks[4], ks[5], hidden_size, output_size)
    return {"w1": w1, "b1": b1, "w2": w2, "b2": b2, "w3": w3, "b3": b3}


def pad_params(params, matmul_dtype=jnp.float32):
    """One-time weight prep.

    Only the *hidden* dim is zero-padded to a lane multiple (it never touches
    HBM per call); input/output feature dims stay at their true sizes so the
    per-call activation traffic is not inflated.  Biases are pre-broadcast to
    8 sublane rows (clean (8, lane) VMEM tiles) and kept f32.  Weights may be
    stored bf16 for the opt-in MXU-native mode.
    """
    in_size, hidden = params["w1"].shape
    out_size = params["w3"].shape[1]
    hid_p = _round_up(hidden, LANE)

    def pad_w(a, rows, cols):
        return jnp.pad(a, ((0, rows - a.shape[0]),
                           (0, cols - a.shape[1]))).astype(matmul_dtype)

    def pad_b(b, cols):
        bp = jnp.pad(b, ((0, 0), (0, cols - b.shape[1])))
        return jnp.broadcast_to(bp, (SUBLANE, cols)).astype(jnp.float32)

    return {
        "w1": pad_w(params["w1"], in_size, hid_p), "b1": pad_b(params["b1"], hid_p),
        "w2": pad_w(params["w2"], hid_p, hid_p),   "b2": pad_b(params["b2"], hid_p),
        "w3": pad_w(params["w3"], hid_p, out_size), "b3": pad_b(params["b3"], out_size),
        "in_size": in_size, "hidden_size": hidden, "out_size": out_size,
        "hid_p": hid_p,
    }


def _choose_tile_m(N, cap=2048):
    """Batch tile: minimize padding, cap at `cap`, >=2 steps when N is large
    so the 'parallel' axis can shard across both v7x TensorCores."""
    steps = max(1, pl.cdiv(N, cap))
    if steps < 2 and N >= 256:
        steps = 2
    return _round_up(pl.cdiv(N, steps), SUBLANE)


# ----------------------------------------------------------------------------
# Wrapper: batch-tiled pallas_call.
# ----------------------------------------------------------------------------
def object_model_forward(C, pp, *, tile_m_cap=2048):
    """C: [N, input_size] float32; pp: output of pad_params."""
    N, in_size = C.shape
    assert in_size == pp["in_size"]
    hid_p, out_size = pp["hid_p"], pp["out_size"]

    tm = _choose_tile_m(N, tile_m_cap)
    n_pad = _round_up(N, tm)
    grid = (n_pad // tm,)

    # Only (cheap) batch-row padding; feature dims are passed at true size.
    x = C if n_pad == N else jnp.pad(C, ((0, n_pad - N), (0, 0)))

    w_item = jnp.dtype(pp["w1"].dtype).itemsize
    weight_bytes = (pp["w1"].size + pp["w2"].size + pp["w3"].size) * w_item \
                 + (pp["b1"].size + pp["b2"].size + pp["b3"].size) * 4
    # TODO(synk): for hidden sizes whose resident weights exceed ~24 MiB
    # (v7x scoped VMEM), add a hidden-feature grid axis and tile w2/w3.
    assert weight_bytes <= 24 * 1024 * 1024, "resident weights need feature tiling"

    # Conservative per-step VMEM estimate (double-buffered x/out/weights plus
    # f32 hidden temporaries); raise the scoped limit if it would not fit.
    vmem_need = (2 * weight_bytes
                 + 4 * (2 * tm * in_size + 2 * tm * out_size + 2 * tm * hid_p))
    vmem_limit_bytes = None
    if vmem_need > 12 * 1024 * 1024:
        vmem_limit_bytes = min(int(vmem_need * 1.5), 100 * 1024 * 1024)

    flops = 2 * n_pad * (in_size * hid_p + hid_p * hid_p + hid_p * out_size)
    bytes_accessed = 4 * (n_pad * in_size + n_pad * out_size) + weight_bytes

    const = lambda i: (0, 0)   # weights / biases: VMEM-resident across steps
    tiled = lambda i: (i, 0)   # activations / output: tiled along batch

    out_padded = pl.pallas_call(
        object_model_kernel,
        out_shape=jax.ShapeDtypeStruct((n_pad, out_size), jnp.float32),
        grid=grid,
        in_specs=[
            pl.BlockSpec((tm, in_size), tiled),      # C tile (true feature dim)
            pl.BlockSpec((in_size, hid_p), const),   # w1
            pl.BlockSpec((SUBLANE, hid_p), const),   # b1
            pl.BlockSpec((hid_p, hid_p), const),     # w2
            pl.BlockSpec((SUBLANE, hid_p), const),   # b2
            pl.BlockSpec((hid_p, out_size), const),  # w3
            pl.BlockSpec((SUBLANE, out_size), const),  # b3
        ],
        out_specs=pl.BlockSpec((tm, out_size), tiled),
        compiler_params=pltpu.CompilerParams(
            dimension_semantics=("parallel",),
            vmem_limit_bytes=vmem_limit_bytes),
        cost_estimate=pl.CostEstimate(
            flops=flops, transcendentals=0, bytes_accessed=bytes_accessed),
    )(x, pp["w1"], pp["b1"], pp["w2"], pp["b2"], pp["w3"], pp["b3"])

    return out_padded if n_pad == N else out_padded[:N]


def reference_forward(C, p):
    h1 = jnp.maximum(C @ p["w1"] + p["b1"], 0.0)
    h2 = jnp.maximum(h1 @ p["w2"] + p["b2"], 0.0)
    return h2 @ p["w3"] + p["b3"]


if __name__ == "__main__":
    input_size, output_size, hidden_size = 16, 8, 32
    batch = 8

    key = jax.random.PRNGKey(0)
    k_params, k_x = jax.random.split(key)
    params = init_params(k_params, input_size, output_size, hidden_size)
    C = jax.random.normal(k_x, (batch, input_size), jnp.float32)

    # Default f32 path: matches the PyTorch reference math.
    pp = pad_params(params)
    out = jax.block_until_ready(object_model_forward(C, pp))
    ref = reference_forward(C, params)
    assert out.shape == (batch, output_size)
    assert jnp.allclose(out, ref, atol=1e-5, rtol=1e-5)

    # Opt-in bf16 matmul mode (MXU-native, f32 accumulation) — looser numerics.
    pp_bf16 = pad_params(params, matmul_dtype=jnp.bfloat16)
    out_bf16 = jax.block_until_ready(object_model_forward(C, pp_bf16))
    assert out_bf16.shape == (batch, output_size)
    assert bool(jnp.all(jnp.isfinite(out_bf16)))

    print("KERNEL_OK")
</pallas_src>

<mosaic_0001>
module attributes {stable_mosaic.version = 11 : i64} {
  func.func @object_model_kernel(%arg0: i32, %arg1: memref<8x16xf32, #tpu.memory_space<vmem>>, %arg2: memref<16x128xf32, #tpu.memory_space<vmem>>, %arg3: memref<8x128xf32, #tpu.memory_space<vmem>>, %arg4: memref<128x128xf32, #tpu.memory_space<vmem>>, %arg5: memref<8x128xf32, #tpu.memory_space<vmem>>, %arg6: memref<128x8xf32, #tpu.memory_space<vmem>>, %arg7: memref<8x8xf32, #tpu.memory_space<vmem>>, %arg8: memref<8x8xf32, #tpu.memory_space<vmem>>) attributes {dimension_semantics = [#tpu.dimension_semantics<parallel>], iteration_bounds = array<i64: 1>, scalar_prefetch = 0 : i64, scratch_operands = 0 : i64, tpu.core_type = #tpu.core_type<tc>, window_params = [{transform_indices = @transform_0, window_bounds = array<i64: 8, 16>}, {pipeline_mode = #tpu.pipeline_mode<synchronous>, transform_indices = @transform_1, window_bounds = array<i64: 16, 128>}, {pipeline_mode = #tpu.pipeline_mode<synchronous>, transform_indices = @transform_2, window_bounds = array<i64: 8, 128>}, {pipeline_mode = #tpu.pipeline_mode<synchronous>, transform_indices = @transform_3, window_bounds = array<i64: 128, 128>}, {pipeline_mode = #tpu.pipeline_mode<synchronous>, transform_indices = @transform_4, window_bounds = array<i64: 8, 128>}, {pipeline_mode = #tpu.pipeline_mode<synchronous>, transform_indices = @transform_5, window_bounds = array<i64: 128, 8>}, {pipeline_mode = #tpu.pipeline_mode<synchronous>, transform_indices = @transform_6, window_bounds = array<i64: 8, 8>}, {transform_indices = @transform_7, window_bounds = array<i64: 8, 8>}]} {
    %c0 = arith.constant 0 : index
    %c0_0 = arith.constant 0 : index
    %0 = vector.load %arg1[%c0, %c0_0] : memref<8x16xf32, #tpu.memory_space<vmem>>, vector<8x16xf32>
    %c0_1 = arith.constant 0 : index
    %c0_2 = arith.constant 0 : index
    %1 = vector.load %arg2[%c0_1, %c0_2] : memref<16x128xf32, #tpu.memory_space<vmem>>, vector<16x128xf32>
    %cst = arith.constant dense<0.000000e+00> : vector<8x128xf32>
    %2 = tpu.matmul %0, %1, %cst {dimension_numbers = #tpu.dot_dimension_numbers<[1], [0], [0], [1], [0, 0, 1, 1], [], []>} : vector<8x16xf32>, vector<16x128xf32>, vector<8x128xf32> -> vector<8x128xf32>
    %c0_3 = arith.constant 0 : index
    %c0_4 = arith.constant 0 : index
    %3 = vector.load %arg3[%c0_3, %c0_4] : memref<8x128xf32, #tpu.memory_space<vmem>>, vector<1x128xf32>
    %4 = vector.broadcast %3 : vector<1x128xf32> to vector<8x128xf32>
    %5 = arith.addf %2, %4 : vector<8x128xf32>
    %cst_5 = arith.constant 0.000000e+00 : f32
    %6 = vector.broadcast %cst_5 : f32 to vector<8x128xf32>
    %7 = arith.maximumf %5, %6 : vector<8x128xf32>
    %c0_6 = arith.constant 0 : index
    %c0_7 = arith.constant 0 : index
    %8 = vector.load %arg4[%c0_6, %c0_7] : memref<128x128xf32, #tpu.memory_space<vmem>>, vector<128x128xf32>
    %cst_8 = arith.constant dense<0.000000e+00> : vector<8x128xf32>
    %9 = tpu.matmul %7, %8, %cst_8 {dimension_numbers = #tpu.dot_dimension_numbers<[1], [0], [0], [1], [0, 0, 1, 1], [], []>} : vector<8x128xf32>, vector<128x128xf32>, vector<8x128xf32> -> vector<8x128xf32>
    %c0_9 = arith.constant 0 : index
    %c0_10 = arith.constant 0 : index
    %10 = vector.load %arg5[%c0_9, %c0_10] : memref<8x128xf32, #tpu.memory_space<vmem>>, vector<1x128xf32>
    %11 = vector.broadcast %10 : vector<1x128xf32> to vector<8x128xf32>
    %12 = arith.addf %9, %11 : vector<8x128xf32>
    %cst_11 = arith.constant 0.000000e+00 : f32
    %13 = vector.broadcast %cst_11 : f32 to vector<8x128xf32>
    %14 = arith.maximumf %12, %13 : vector<8x128xf32>
    %c0_12 = arith.constant 0 : index
    %c0_13 = arith.constant 0 : index
    %15 = vector.load %arg6[%c0_12, %c0_13] : memref<128x8xf32, #tpu.memory_space<vmem>>, vector<128x8xf32>
    %cst_14 = arith.constant dense<0.000000e+00> : vector<8x8xf32>
    %16 = tpu.matmul %14, %15, %cst_14 {dimension_numbers = #tpu.dot_dimension_numbers<[1], [0], [0], [1], [0, 0, 1, 1], [], []>} : vector<8x128xf32>, vector<128x8xf32>, vector<8x8xf32> -> vector<8x8xf32>
    %c0_15 = arith.constant 0 : index
    %c0_16 = arith.constant 0 : index
    %17 = vector.load %arg7[%c0_15, %c0_16] : memref<8x8xf32, #tpu.memory_space<vmem>>, vector<1x8xf32>
    %18 = vector.broadcast %17 : vector<1x8xf32> to vector<8x8xf32>
    %19 = arith.addf %16, %18 : vector<8x8xf32>
    %c0_17 = arith.constant 0 : index
    %c0_18 = arith.constant 0 : index
    %20 = vector.load %arg8[%c0_17, %c0_18] : memref<8x8xf32, #tpu.memory_space<vmem>>, vector<8x8xf32>
    tpu.vector_store %arg8[%c0_17, %c0_18], %19 {strides = array<i32>} : memref<8x8xf32, #tpu.memory_space<vmem>>, vector<8x8xf32>,
    return
  }
  func.func @transform_0(%arg0: i32) -> (i32, i32) {
    %c0_i32 = arith.constant 0 : i32
    %c0_i32_0 = arith.constant 0 : i32
    return %arg0, %c0_i32 : i32, i32
  }
  func.func @transform_1(%arg0: i32) -> (i32, i32) {
    %c0_i32 = arith.constant 0 : i32
    %c0_i32_0 = arith.constant 0 : i32
    %c0_i32_1 = arith.constant 0 : i32
    return %c0_i32, %c0_i32_0 : i32, i32
  }
  func.func @transform_2(%arg0: i32) -> (i32, i32) {
    %c0_i32 = arith.constant 0 : i32
    %c0_i32_0 = arith.constant 0 : i32
    %c0_i32_1 = arith.constant 0 : i32
    return %c0_i32, %c0_i32_0 : i32, i32
  }
  func.func @transform_3(%arg0: i32) -> (i32, i32) {
    %c0_i32 = arith.constant 0 : i32
    %c0_i32_0 = arith.constant 0 : i32
    %c0_i32_1 = arith.constant 0 : i32
    return %c0_i32, %c0_i32_0 : i32, i32
  }
  func.func @transform_4(%arg0: i32) -> (i32, i32) {
    %c0_i32 = arith.constant 0 : i32
    %c0_i32_0 = arith.constant 0 : i32
    %c0_i32_1 = arith.constant 0 : i32
    return %c0_i32, %c0_i32_0 : i32, i32
  }
  func.func @transform_5(%arg0: i32) -> (i32, i32) {
    %c0_i32 = arith.constant 0 : i32
    %c0_i32_0 = arith.constant 0 : i32
    %c0_i32_1 = arith.constant 0 : i32
    return %c0_i32, %c0_i32_0 : i32, i32
  }
  func.func @transform_6(%arg0: i32) -> (i32, i32) {
    %c0_i32 = arith.constant 0 : i32
    %c0_i32_0 = arith.constant 0 : i32
    %c0_i32_1 = arith.constant 0 : i32
    return %c0_i32, %c0_i32_0 : i32, i32
  }
  func.func @transform_7(%arg0: i32) -> (i32, i32) {
    %c0_i32 = arith.constant 0 : i32
    %c0_i32_0 = arith.constant 0 : i32
    return %arg0, %c0_i32 : i32, i32
  }
}

</mosaic_0001>

<bundles_post_ra>
// kernel: tpu_custom_call.1
= control target key start
LH: loop header
LB: loop body
LE: loop exit
PB: predicated region body
PF: predicated region fallthrough
CT: control target
= control target key end

     0   :  { %12 = vsyncpa [#allocation3], 0  ;;  %s512_s0 = inlined_call_operand.vmem [shape: f32[8,16], index: 0, kind: input, shape index: {}]   ;;  %s513_s1 = inlined_call_operand.hbm [shape: f32[16,128], index: 1, kind: input, shape index: {}]   ;;  %s514_s2 = inlined_call_operand.hbm [shape: f32[8,128], index: 2, kind: input, shape index: {}]   ;;  %s515_s3 = inlined_call_operand.vmem [shape: f32[128,128], index: 3, kind: input, shape index: {}]   ;;  %s516_s4 = inlined_call_operand.hbm [shape: f32[8,128], index: 4, kind: input, shape index: {}]   ;;  %s517_s5 = inlined_call_operand.vmem [shape: f32[128,8], index: 5, kind: input, shape index: {}]   ;;  %s518_s6 = inlined_call_operand.hbm [shape: f32[8,8], index: 6, kind: input, shape index: {}]   ;;  %s519_s7 = inlined_call_operand.hbm [shape: f32[8,8], index: 7, kind: output, shape index: {}]  }
   0x1   :  { %13 = vsyncpa [#allocation6], 0 }
   0x2   :  { %14 = vsyncpa [#allocation9], 0  ;;  %s36_s26 = sshll.u32 %s514_s2, 4  ;;  %s37_s26 = int_to_ptr.hbm [resolvable:$true] %s36_s26 }
   0x3   :  { %15 = vsyncpa [#allocation4], 0  ;;  %s351_s27 = smov [#allocation5]   ;;  %s22_s8 = sshll.u32 %s513_s1, 4  ;;  %s23_s8 = int_to_ptr.hbm [resolvable:$true] %s22_s8 }
   0x4   :  { %s38_s28 = sshll.u32 %s351_s27, 4  ;;  %s352_s9 = smov [#allocation2]   ;;  %s39_s28 = int_to_ptr.vmem [resolvable:$true] %s38_s28 }
   0x5   :  { %41 = dma.hbm_to_vmem [thread:$0]  %s37_s26, 128, %s39_s28, [#allocation6]  }
   0x6   :  { %s24_s10 = sshll.u32 %s352_s9, 4  ;;  %s353_s11 = smov 128   ;;  %s25_s10 = int_to_ptr.vmem [resolvable:$true] %s24_s10 }
   0x7   :  { %s354_s12 = smov 8   ;;  %s49_s2 = sshll.u32 %s516_s4, 4  ;;  %s50_s2 = int_to_ptr.hbm [resolvable:$true] %s49_s2 }
   0x8   :  { %30 = dma.hbm_to_vmem [thread:$0]  %s23_s8, 256, %s25_s10, [#allocation3], %s353_s11, %s353_s11, %s354_s12  }
   0x9   :  { %s355_s15 = smov [#allocation7]   ;;  %s62_s1 = sshll.u32 %s518_s6, 4  ;;  %s63_s1 = int_to_ptr.hbm [resolvable:$true] %s62_s1 }
   0xa   :  { %s51_s16 = sshll.u32 %s355_s15, 4  ;;  %s356_s19 = smov [#allocation8]   ;;  %s52_s16 = int_to_ptr.vmem [resolvable:$true] %s51_s16 }
   0xb   :  { %54 = dma.hbm_to_vmem [thread:$0]  %s50_s2, 128, %s52_s16, [#allocation6]  }
   0xc   :  { %s64_s20 = sshll.u32 %s356_s19, 4  ;;  %s65_s20 = int_to_ptr.vmem [resolvable:$true] %s64_s20 }
   0xd   :  { %67 = dma.hbm_to_vmem [thread:$0]  %s63_s1, 128, %s65_s20, [#allocation9]  }
   0xe   :  { %343 = dma.done.wait [#allocation3], 256  }
   0xf   :  { %344 = vsyncadd [#allocation3], 4294967040 }
  0x10   :  { %345 = dma.done.wait [#allocation6], 256  }
  0x11   :  { %346 = vsyncadd [#allocation6], 4294967040 }
  0x12   :  { %347 = dma.done.wait [#allocation9], 128  }
  0x13   :  { %348 = vsyncadd [#allocation9], 4294967168  ;;  %v86_v0 = vld [vmem:[#allocation2 + $0x8] sm:$0xff]  ;;  %v85_v1 = vld [vmem:[#allocation2] sm:$0xff]  ;;  %vm89_vm0 = vcmask 130048   ;;  %s357_s28 = smov [#allocation10]  }
  0x14   :  { %107 = vmatpush.msra.mxu0 %v86_v0  ;;  %v84_v2 = vld [vmem:[%s512_s0] sm:$0xff]  ;;  %v129_v3 = vld [vmem:[%s515_s3 + $0x78] sm:$0xff]  ;;  %v128_v4 = vld [vmem:[%s515_s3 + $0x70] sm:$0xff]  ;;  %s198_s0 = sshll.u32 %s357_s28, 4  ;;  %s200_s8 = sshll.u32 %s519_s7, 4  ;;  %vm191_vm1 = vcmask 64512   ;;  %s199_s0 = int_to_ptr.vmem [resolvable:$true] %s198_s0  ;;  %s201_s8 = int_to_ptr.hbm [resolvable:$true] %s200_s8 }
  0x15   :  { %132 = vmatpush.msra.mxu1 %v129_v3  ;;  %v127_v5 = vld [vmem:[%s515_s3 + $0x68] sm:$0xff]  ;;  %v126_v6 = vld [vmem:[%s515_s3 + $0x60] sm:$0xff]  ;;  %v125_v7 = vld [vmem:[%s515_s3 + $0x58] sm:$0xff] }
  0x16   :  { %108 = vmatpush.msra.mxu0 %v85_v1  ;;  %v124_v8 = vld [vmem:[%s515_s3 + $0x50] sm:$0xff]  ;;  %v123_v9 = vld [vmem:[%s515_s3 + $0x48] sm:$0xff]  ;;  %v122_v10 = vld [vmem:[%s515_s3 + $0x40] sm:$0xff] }
  0x17   :  { %212 = vmatmul.msk.f32.vlgmr.msra.gmra.mxu0 %vm89_vm0, %v84_v2  ;;  %133 = vmatpush.msra.mxu1 %v128_v4  ;;  %v121_v11 = vld [vmem:[%s515_s3 + $0x38] sm:$0xff]  ;;  %v120_v12 = vld [vmem:[%s515_s3 + $0x30] sm:$0xff]  ;;  %v119_v13 = vld [vmem:[%s515_s3 + $0x28] sm:$0xff] }
  0x18   :  { %v118_v14 = vld [vmem:[%s515_s3 + $0x20] sm:$0xff]  ;;  %v117_v15 = vld [vmem:[%s515_s3 + $0x18] sm:$0xff]  ;;  %v116_v16 = vld [vmem:[%s515_s3 + $0x10] sm:$0xff] }
  0x19   :  { %134 = vmatpush.msra.mxu1 %v127_v5  ;;  %v115_v17 = vld [vmem:[%s515_s3 + $0x8] sm:$0xff]  ;;  %v114_v18 = vld [vmem:[%s515_s3] sm:$0xff]  ;;  %v168_v19 = vld [vmem:[%s517_s5 + $0x78] sm:$0xff] }
  0x1a   :  { %v167_v20 = vld [vmem:[%s517_s5 + $0x70] sm:$0xff]  ;;  %171 = vmatpush.msra.mxu2 %v168_v19  ;;  %v166_v21 = vld [vmem:[%s517_s5 + $0x68] sm:$0xff]  ;;  %v165_v22 = vld [vmem:[%s517_s5 + $0x60] sm:$0xff] }
  0x1b   :  { %135 = vmatpush.msra.mxu1 %v126_v6  ;;  %v164_v23 = vld [vmem:[%s517_s5 + $0x58] sm:$0xff]  ;;  %v163_v24 = vld [vmem:[%s517_s5 + $0x50] sm:$0xff]  ;;  %v162_v25 = vld [vmem:[%s517_s5 + $0x48] sm:$0xff] }
  0x1c   :  { %172 = vmatpush.msra.mxu2 %v167_v20  ;;  %v161_v26 = vld [vmem:[%s517_s5 + $0x40] sm:$0xff]  ;;  %v160_v27 = vld [vmem:[%s517_s5 + $0x38] sm:$0xff]  ;;  %v159_v28 = vld [vmem:[%s517_s5 + $0x30] sm:$0xff] }
  0x1d   :  { %136 = vmatpush.msra.mxu1 %v125_v7  ;;  %v158_v29 = vld [vmem:[%s517_s5 + $0x28] sm:$0xff]  ;;  %v157_v30 = vld [vmem:[%s517_s5 + $0x20] sm:$0xff]  ;;  %v156_v31 = vld [vmem:[%s517_s5 + $0x18] sm:$0xff] }
  0x1e   :  { %173 = vmatpush.msra.mxu2 %v166_v21  ;;  %v220_v32 = vld [vmem:[#allocation5] ss:$0 sm:$0xff]  ;;  %v154_v37 = vld [vmem:[%s517_s5 + $0x8] sm:$0xff]  ;;  %v153_v38 = vld [vmem:[%s517_s5] sm:$0xff] }
  0x1f   :  { %137 = vmatpush.msra.mxu1 %v124_v8  ;;  %v155_v36 = vld [vmem:[%s517_s5 + $0x10] sm:$0xff]  ;;  %v221_v39 = vld [vmem:[#allocation7] ss:$0 sm:$0xff]  ;;  %v222_v43 = vld [vmem:[#allocation8] ss:$0 sm:$0xff] }
  0x20   :  { %174 = vmatpush.msra.mxu2 %v165_v22 }
  0x21   :  { %138 = vmatpush.msra.mxu1 %v123_v9 }
  0x22   :  { %175 = vmatpush.msra.mxu2 %v164_v23 }
  0x23   :  { %139 = vmatpush.msra.mxu1 %v122_v10 }
  0x24   :  { %176 = vmatpush.msra.mxu2 %v163_v24 }
  0x25   :  { %140 = vmatpush.msra.mxu1 %v121_v11 }
  0x26   :  { %177 = vmatpush.msra.mxu2 %v162_v25 }
  0x27   :  { %141 = vmatpush.msra.mxu1 %v120_v12 }
  0x28   :  { %178 = vmatpush.msra.mxu2 %v161_v26 }
  0x29   :  { %142 = vmatpush.msra.mxu1 %v119_v13 }
  0x2a   :  { %179 = vmatpush.msra.mxu2 %v160_v27 }
  0x2b   :  { %143 = vmatpush.msra.mxu1 %v118_v14 }
  0x2c   :  { %180 = vmatpush.msra.mxu2 %v159_v28 }
  0x2d   :  { %144 = vmatpush.msra.mxu1 %v117_v15 }
  0x2e   :  { %181 = vmatpush.msra.mxu2 %v158_v29 }
  0x2f   :  { %145 = vmatpush.msra.mxu1 %v116_v16 }
  0x30   :  { %182 = vmatpush.msra.mxu2 %v157_v30 }
  0x31   :  { %146 = vmatpush.msra.mxu1 %v115_v17 }
  0x32   :  { %183 = vmatpush.msra.mxu2 %v156_v31 }
  0x33   :  { %147 = vmatpush.msra.mxu1 %v114_v18 }
  0x34   :  { %184 = vmatpush.msra.mxu2 %v155_v36 }
  0x36   :  { %185 = vmatpush.msra.mxu2 %v154_v37 }
  0x38   :  { %186 = vmatpush.msra.mxu2 %v153_v38 }
  0x94   :  { %v110_v33 = vpop.f32.mrf.mxu0 }
  0x95   :  { %v111_v34 = vadd.f32 %v220_v32, %v110_v33 }
  0x97   :  { %v113_v35 = vmax.f32 %v111_v34, 0.0 }
  0x99   :  { %148 = vmatmul.f32.vlgmr.msra.gmra.mxu1 %v113_v35 }
 0x116   :  { %v149_v40 = vpop.f32.mrf.mxu1 }
 0x117   :  { %v150_v41 = vadd.f32 %v221_v39, %v149_v40 }
 0x119   :  { %v152_v42 = vmax.f32 %v150_v41, 0.0 }
 0x11b   :  { %187 = vmatmul.f32.vlgmr.msra.gmra.mxu2 %v152_v42 }
 0x19e   :  { %v188_v44 = vpop.f32.mrf.mxu2 }
 0x19f   :  { %v189_v45 = vadd.f32 %v222_v43, %v188_v44 }
 0x1a1   :  { %192 = vst.msk [vmem:[#allocation10] sm:$0xff] %vm191_vm1, %v189_v45 }
 0x1a2   :  { %203 = dma.vmem_to_hbm [thread:$0]  %s199_s0, 128, %s201_s8, [#allocation4]  }
 0x1a3   :  { %349 = dma.done.wait [#allocation4], 128  }
 0x1a4   :  { %350 = vsyncadd [#allocation4], 4294967168 }
 0x1a5   :  { %208 = vsyncpa [#allocation3], 1 }
 0x1a6   :  { %209 = vsyncpa [#allocation6], 1 }
 0x1a7   :  { %210 = vsyncpa [#allocation9], 1 }
 0x1a8   :  { %211 = vsyncpa [#allocation4], 1 }

</bundles_post_ra>
